<compile_context>
chip_gen: v7x
topology: tpu7x:2x2x1
jax: 0.10.0
libtpu: 0.0.40
codegen_flags: <defaults>
</compile_context>

<pallas_src>
import jax
import jax.numpy as jnp
from jax import lax
from jax.experimental import pallas as pl
from jax.experimental.pallas import tpu as pltpu


# ----------------------------------------------------------------------------
# Kernel 1: conv matmul + per-tile partial sum / sum-of-squares (batch stats)
# ----------------------------------------------------------------------------
def _stats_kernel(w_ref, p_ref, sum_ref, ssq_ref):
    # bf16 operands straight to the MXU, f32 accumulation.
    y = jnp.dot(w_ref[...], p_ref[...],
                preferred_element_type=jnp.float32)          # (Cout, tile_hw)
    sum_ref[...] = jnp.sum(y, axis=1, keepdims=True)         # (Cout, 1) partial
    ssq_ref[...] = jnp.sum(y * y, axis=1, keepdims=True)


# ----------------------------------------------------------------------------
# Kernel 2: conv matmul fused with folded BatchNorm (scale/shift) + Swish
# ----------------------------------------------------------------------------
def _conv_bn_swish_kernel(w_ref, p_ref, sc_ref, sh_ref, o_ref):
    y = jnp.dot(w_ref[...], p_ref[...],
                preferred_element_type=jnp.float32)          # (Cout, tile_hw)
    z = y * sc_ref[...] + sh_ref[...]                        # folded BN (VPU)
    # Swish with a single EUP transcendental: sigmoid(z) = 0.5*(1+tanh(z/2)).
    o_ref[...] = 0.5 * z * (1.0 + jnp.tanh(0.5 * z))


# ----------------------------------------------------------------------------
# JAX glue
# ----------------------------------------------------------------------------
def _patches_bkd(x_b, k, s):
    """(B,C,H,W) -> (B, C*k*k, Ho*Wo); Kd order matches OIHW weight flatten."""
    B, C, H, W = x_b.shape
    Ho = (H - k) // s + 1
    Wo = (W - k) // s + 1
    if k == 1:
        xs = x_b if s == 1 else x_b[:, :, ::s, ::s]
        return xs[:, :, :Ho, :Wo].reshape(B, C, Ho * Wo), Ho, Wo
    # TODO(synk): for real K>1 convs, gather patches inside the kernel (index
    # map over (ho, wo) blocks of an NHWC input) instead of materializing the
    # K^2-inflated im2col buffer in HBM.
    cols = [x_b[:, :, i:i + s * Ho:s, j:j + s * Wo:s]
            for i in range(k) for j in range(k)]              # each (B,C,Ho,Wo)
    p = jnp.stack(cols, axis=2)                               # (B,C,k*k,Ho,Wo)
    return p.reshape(B, C * k * k, Ho * Wo), Ho, Wo


def _vmem_limit_bytes():
    """Generation-aware scoped-VMEM limit (v5e/v6e: 128 MiB phys, v7x: 64)."""
    phys = 64 * 1024 * 1024                                   # conservative floor
    try:
        phys = int(pltpu.get_tpu_info().vmem_capacity_bytes)
    except Exception:
        pass
    return min(phys // 2, 96 * 1024 * 1024)


def _pick_tile_hw(hw, cout, kd, vmem_limit, cap=16384):
    """Largest 128-multiple tile that fits the VMEM budget with bounded
    zero-padding waste.  Returns (tile_hw, padded_hw)."""
    hw128 = -(-hw // 128) * 128
    # per-lane-column VMEM bytes in pass 2: bf16 patch (x2 buffers) + f32
    # output (x2 buffers) + ~3x f32 elementwise temporaries (y, z, swish).
    per_col = 2 * 2 * kd + (2 + 3) * 4 * cout
    t = max(128, min(cap, hw128,
                     (int(vmem_limit * 0.6) // per_col) // 128 * 128))
    while t > 128:
        pad = -(-hw // t) * t - hw
        if pad * 8 <= hw or pad < 128:
            break
        t -= 128
    return t, -(-hw // t) * t


def last_conv(x, conv_w, bn_gamma, bn_beta, *, strides, kernel_size, eps=1e-3):
    """x: (B, Cin, H, W) NCHW.  conv_w: (Cout, Cin, K, K).  Returns NCHW f32.
    BatchNorm is applied in training mode (batch statistics), eps=1e-3 as in
    the PyTorch module (momentum only affects running buffers, not the fwd)."""
    B, Cin, H, W = x.shape
    Cout = conv_w.shape[0]
    K, S = kernel_size, strides
    Kd = Cin * K * K

    # bf16 streaming of the big operand (cast BEFORE any relayout).
    p_b, Ho, Wo = _patches_bkd(x.astype(jnp.bfloat16), K, S)   # (B, Kd, Ho*Wo)
    hw = Ho * Wo
    M = B * hw                                                 # true stat count

    vmem_limit = _vmem_limit_bytes()
    tile_hw, hwp = _pick_tile_hw(hw, Cout, Kd, vmem_limit)
    if hwp != hw:
        # Zero patches give y == 0 -> no contribution to sum / sum-of-squares,
        # so stats stay exact; padded output columns are sliced off below.
        p_b = jnp.pad(p_b, ((0, 0), (0, 0), (0, hwp - hw)))
    n_hw = hwp // tile_hw

    w_t = conv_w.reshape(Cout, Kd).astype(jnp.bfloat16)        # resident weights

    cparams = pltpu.CompilerParams(
        dimension_semantics=("parallel", "parallel"),
        vmem_limit_bytes=vmem_limit)

    w_spec = pl.BlockSpec((Cout, Kd), lambda b, t: (0, 0))
    p_spec = pl.BlockSpec((None, Kd, tile_hw), lambda b, t: (b, 0, t))

    # ---- pass 1: per-tile partial statistics of the conv output ------------
    psum, pssq = pl.pallas_call(
        _stats_kernel,
        out_shape=(
            jax.ShapeDtypeStruct((B, n_hw, Cout, 1), jnp.float32),
            jax.ShapeDtypeStruct((B, n_hw, Cout, 1), jnp.float32),
        ),
        grid_spec=pltpu.PrefetchScalarGridSpec(
            num_scalar_prefetch=0,
            grid=(B, n_hw),
            in_specs=[w_spec, p_spec],
            out_specs=[
                pl.BlockSpec((None, None, Cout, 1), lambda b, t: (b, t, 0, 0)),
                pl.BlockSpec((None, None, Cout, 1), lambda b, t: (b, t, 0, 0)),
            ],
        ),
        compiler_params=cparams,
        cost_estimate=pl.CostEstimate(
            flops=2 * B * hwp * Kd * Cout + 3 * B * hwp * Cout,
            transcendentals=0,
            bytes_accessed=B * hwp * Kd * 2 + Cout * Kd * 2
                           + 2 * B * n_hw * Cout * 4),
    )(w_t, p_b)

    # ---- glue: fold training-mode BatchNorm into per-channel scale/shift ----
    # TODO(synk): E[y^2]-E[y]^2 in f32 is cancellation-prone for huge M or
    # mean-dominated activations; use a split-f32 accumulator in that regime.
    mean = jnp.sum(psum, axis=(0, 1)) / float(M)               # (Cout, 1)
    var = jnp.maximum(jnp.sum(pssq, axis=(0, 1)) / float(M) - mean * mean, 0.0)
    inv = lax.rsqrt(var + eps)
    scale = bn_gamma.reshape(Cout, 1).astype(jnp.float32) * inv
    shift = bn_beta.reshape(Cout, 1).astype(jnp.float32) - mean * scale

    # ---- pass 2: conv matmul + BN + Swish, written straight into NCHW ------
    out3 = pl.pallas_call(
        _conv_bn_swish_kernel,
        out_shape=jax.ShapeDtypeStruct((B, Cout, hwp), jnp.float32),
        grid_spec=pltpu.PrefetchScalarGridSpec(
            num_scalar_prefetch=0,
            grid=(B, n_hw),
            in_specs=[
                w_spec,
                p_spec,
                pl.BlockSpec((Cout, 1), lambda b, t: (0, 0)),
                pl.BlockSpec((Cout, 1), lambda b, t: (0, 0)),
            ],
            out_specs=pl.BlockSpec((None, Cout, tile_hw),
                                   lambda b, t: (b, 0, t)),
        ),
        compiler_params=cparams,
        cost_estimate=pl.CostEstimate(
            flops=2 * B * hwp * Kd * Cout + 4 * B * hwp * Cout,
            transcendentals=B * hwp * Cout,
            bytes_accessed=B * hwp * Kd * 2 + Cout * Kd * 2 + 2 * Cout * 4
                           + B * hwp * Cout * 4),
    )(w_t, p_b, scale, shift)

    if hwp != hw:
        out3 = out3[:, :, :hw]
    # (B, Cout, Ho*Wo) -> (B, Cout, Ho, Wo): free reshape, no transpose.
    return out3.reshape(B, Cout, Ho, Wo)


# ----------------------------------------------------------------------------
# Pure-JAX reference (PyTorch semantics, training-mode BatchNorm, eps=1e-3)
# ----------------------------------------------------------------------------
def last_conv_ref(x, conv_w, bn_gamma, bn_beta, *, strides, kernel_size,
                  eps=1e-3):
    y = lax.conv_general_dilated(
        x.astype(jnp.float32), conv_w.astype(jnp.float32),
        window_strides=(strides, strides), padding="VALID",
        dimension_numbers=("NCHW", "OIHW", "NCHW"))
    mean = jnp.mean(y, axis=(0, 2, 3), keepdims=True)
    var = jnp.mean((y - mean) ** 2, axis=(0, 2, 3), keepdims=True)  # biased
    yhat = (y - mean) * lax.rsqrt(var + eps)
    yhat = yhat * bn_gamma.reshape(1, -1, 1, 1) + bn_beta.reshape(1, -1, 1, 1)
    return yhat * jax.nn.sigmoid(yhat)


if __name__ == "__main__":
    # LastConv(in_channels=4, out_channels=32, strides=1, kernel_size=1)
    B, Cin, H, W = 2, 4, 16, 16
    Cout, K, S = 32, 1, 1

    key = jax.random.PRNGKey(0)
    kx, kw, kg, kb = jax.random.split(key, 4)
    x = jax.random.normal(kx, (B, Cin, H, W), dtype=jnp.float32)
    conv_w = jax.random.normal(kw, (Cout, Cin, K, K), dtype=jnp.float32) * 0.1
    bn_gamma = 1.0 + 0.1 * jax.random.normal(kg, (Cout,), dtype=jnp.float32)
    bn_beta = 0.1 * jax.random.normal(kb, (Cout,), dtype=jnp.float32)

    out = jax.block_until_ready(
        last_conv(x, conv_w, bn_gamma, bn_beta, strides=S, kernel_size=K))

    # Tight check vs a reference fed the same bf16-rounded conv operands
    xq = x.astype(jnp.bfloat16).astype(jnp.float32)
    wq = conv_w.astype(jnp.bfloat16).astype(jnp.float32)
    ref_q = last_conv_ref(xq, wq, bn_gamma, bn_beta, strides=S, kernel_size=K)
    assert out.shape == ref_q.shape == (B, Cout, H, W)
    err_q = float(jnp.max(jnp.abs(out - ref_q)))
    assert err_q < 2e-3, f"mismatch vs bf16-consistent reference: {err_q}"

    # Looser sanity check vs the pure-f32 reference (bf16 input streaming)
    ref = last_conv_ref(x, conv_w, bn_gamma, bn_beta, strides=S, kernel_size=K)
    err = float(jnp.max(jnp.abs(out - ref)))
    assert err < 1e-1, f"mismatch vs f32 reference: {err}"

    print("KERNEL_OK")
</pallas_src>

<mosaic_0001>
module attributes {stable_mosaic.version = 11 : i64} {
  func.func @_stats_kernel(%arg0: i32, %arg1: i32, %arg2: memref<32x4xbf16, #tpu.memory_space<vmem>>, %arg3: memref<1x4x256xbf16, #tpu.memory_space<vmem>>, %arg4: memref<1x1x32x1xf32, #tpu.memory_space<vmem>>, %arg5: memref<1x1x32x1xf32, #tpu.memory_space<vmem>>) attributes {dimension_semantics = [#tpu.dimension_semantics<parallel>, #tpu.dimension_semantics<parallel>], iteration_bounds = array<i64: 2, 1>, scalar_prefetch = 0 : i64, scratch_operands = 0 : i64, tpu.core_type = #tpu.core_type<tc>, window_params = [{pipeline_mode = #tpu.pipeline_mode<synchronous>, transform_indices = @transform_0, window_bounds = array<i64: 32, 4>}, {transform_indices = @transform_1, window_bounds = array<i64: 1, 4, 256>}, {transform_indices = @transform_2, window_bounds = array<i64: 1, 1, 32, 1>}, {transform_indices = @transform_3, window_bounds = array<i64: 1, 1, 32, 1>}]} {
    %c0 = arith.constant 0 : index
    %c0_0 = arith.constant 0 : index
    %0 = vector.load %arg2[%c0, %c0_0] : memref<32x4xbf16, #tpu.memory_space<vmem>>, vector<32x4xbf16>
    %c0_1 = arith.constant 0 : index
    %c0_2 = arith.constant 0 : index
    %c0_3 = arith.constant 0 : index
    %1 = vector.load %arg3[%c0_1, %c0_2, %c0_3] : memref<1x4x256xbf16, #tpu.memory_space<vmem>>, vector<1x4x256xbf16>
    %2 = vector.shape_cast %1 : vector<1x4x256xbf16> to vector<4x256xbf16>
    %cst = arith.constant dense<0.000000e+00> : vector<32x256xf32>
    %3 = tpu.matmul %0, %2, %cst {dimension_numbers = #tpu.dot_dimension_numbers<[1], [0], [0], [1], [0, 0, 1, 1], [], []>} : vector<32x4xbf16>, vector<4x256xbf16>, vector<32x256xf32> -> vector<32x256xf32>
    %cst_4 = arith.constant dense<0.000000e+00> : vector<32xf32>
    %4 = vector.multi_reduction <add>, %3, %cst_4 [1] : vector<32x256xf32> to vector<32xf32>
    %5 = vector.shape_cast %4 : vector<32xf32> to vector<32x1xf32>
    %c0_5 = arith.constant 0 : index
    %c0_6 = arith.constant 0 : index
    %c0_7 = arith.constant 0 : index
    %c0_8 = arith.constant 0 : index
    %6 = vector.load %arg4[%c0_5, %c0_6, %c0_7, %c0_8] : memref<1x1x32x1xf32, #tpu.memory_space<vmem>>, vector<1x1x32x1xf32>
    %7 = vector.shape_cast %6 : vector<1x1x32x1xf32> to vector<32x1xf32>
    %8 = vector.shape_cast %5 : vector<32x1xf32> to vector<1x1x32x1xf32>
    tpu.vector_store %arg4[%c0_5, %c0_6, %c0_7, %c0_8], %8 {strides = array<i32>} : memref<1x1x32x1xf32, #tpu.memory_space<vmem>>, vector<1x1x32x1xf32>,
    %9 = arith.mulf %3, %3 : vector<32x256xf32>
    %cst_9 = arith.constant dense<0.000000e+00> : vector<32xf32>
    %10 = vector.multi_reduction <add>, %9, %cst_9 [1] : vector<32x256xf32> to vector<32xf32>
    %11 = vector.shape_cast %10 : vector<32xf32> to vector<32x1xf32>
    %c0_10 = arith.constant 0 : index
    %c0_11 = arith.constant 0 : index
    %c0_12 = arith.constant 0 : index
    %c0_13 = arith.constant 0 : index
    %12 = vector.load %arg5[%c0_10, %c0_11, %c0_12, %c0_13] : memref<1x1x32x1xf32, #tpu.memory_space<vmem>>, vector<1x1x32x1xf32>
    %13 = vector.shape_cast %12 : vector<1x1x32x1xf32> to vector<32x1xf32>
    %14 = vector.shape_cast %11 : vector<32x1xf32> to vector<1x1x32x1xf32>
    tpu.vector_store %arg5[%c0_10, %c0_11, %c0_12, %c0_13], %14 {strides = array<i32>} : memref<1x1x32x1xf32, #tpu.memory_space<vmem>>, vector<1x1x32x1xf32>,
    return
  }
  func.func @transform_0(%arg0: i32, %arg1: i32) -> (i32, i32) {
    %c0_i32 = arith.constant 0 : i32
    %c0_i32_0 = arith.constant 0 : i32
    %c0_i32_1 = arith.constant 0 : i32
    return %c0_i32, %c0_i32_0 : i32, i32
  }
  func.func @transform_1(%arg0: i32, %arg1: i32) -> (i32, i32, i32) {
    %c0_i32 = arith.constant 0 : i32
    %c0_i32_0 = arith.constant 0 : i32
    return %arg0, %c0_i32, %arg1 : i32, i32, i32
  }
  func.func @transform_2(%arg0: i32, %arg1: i32) -> (i32, i32, i32, i32) {
    %c0_i32 = arith.constant 0 : i32
    %c0_i32_0 = arith.constant 0 : i32
    %c0_i32_1 = arith.constant 0 : i32
    return %arg0, %arg1, %c0_i32, %c0_i32_0 : i32, i32, i32, i32
  }
  func.func @transform_3(%arg0: i32, %arg1: i32) -> (i32, i32, i32, i32) {
    %c0_i32 = arith.constant 0 : i32
    %c0_i32_0 = arith.constant 0 : i32
    %c0_i32_1 = arith.constant 0 : i32
    return %arg0, %arg1, %c0_i32, %c0_i32_0 : i32, i32, i32, i32
  }
}

</mosaic_0001>

<bundles_post_ra>
// kernel: tpu_custom_call.1
= control target key start
LH: loop header
LB: loop body
LE: loop exit
PB: predicated region body
PF: predicated region fallthrough
CT: control target
= control target key end

     0   :  { %s603_s12 = smov 0   ;;  %s605_s13 = smov 0   ;;  %s657_s0 = inlined_call_operand.vmem [shape: bf16[32,4], index: 0, kind: input, shape index: {}]   ;;  %s658_s1 = inlined_call_operand.vmem [shape: bf16[2,4,256], index: 1, kind: input, shape index: {}]   ;;  %s659_s2 = inlined_call_operand.vmem [shape: f32[2,1,32,1], index: 2, kind: output, shape index: {0}]   ;;  %s660_s3 = inlined_call_operand.vmem [shape: f32[2,1,32,1], index: 3, kind: output, shape index: {1}]  }
   0x1   :  { %s607_s14 = smov 0  }
   0x2 LB: > { %s26_s15 = sadd.s32 1, %s576_s13  ;;  %p511_p0 = scmp.ge.s32.totalorder %s580_s14, 1  ;;  %s580_s14 = sphi %s607_s14, %s14_s14   ;;  %s576_s13 = sphi %s605_s13, %s662_s13   ;;  %s572_s12 = sphi %s603_s12, %s661_s12  }
   0x3   : > { %p28_p1 = scmp.ge.s32.totalorder %s26_s15, 2  ;;  %p163_p2 = scmp.lt.s32.totalorder %s580_s14, 3 }
   0x5   : > { %s664_s15 = smov (%p28_p1, %s26_s15), 0  ;;  %p164_p3 = pnand %p511_p0, %p163_p2 }
   0x6   : > { %p205_p4 = scmp.lt.s32.totalorder (!%p164_p3), %s572_s12, 1  ;;  %v582_v0 = vmov (!%p164_p3), 0   ;;  %vm264_vm0 = vcmask (!%p164_p3), 1041408   ;;  %v556_v4 = vld [vmem:[%s657_s0] sm:$0xff] (!%p164_p3)   ;;  %v557_v5 = vld [vmem:[%s657_s0 + $0x8] sm:$0xff] (!%p164_p3)   ;;  %vm257_vm1 = vcmask (!%p164_p3), 31744  }
   0x7   : > { %167 = sbr.rel (%p164_p3) target bundleno = 395 (0x18b), region = 28  ;;  %303 = vmatprep.mubr.bf16.mxu0 (!%p164_p3), %v582_v0  ;;  %313 = vmatprep.mubr.bf16.mxu1 (!%p164_p3), %v582_v0  ;;  %vm336_vm2 = vcmask (!%p164_p3), 7168  }
   0xe   : > { %s666_s12 = smov (!%p205_p4, %s572_s12), 1 }
   0xf   : > { %s526_s16 = sshll.u32 %s666_s12, 2  ;;  %s527_s24 = sshll.u32 %s666_s12, 5 }
  0x10   : > { %s212_s19 = scalar_lea.vmem %s658_s1, %s526_s16  ;;  %s222_s27 = scalar_lea.vmem %s659_s2, %s527_s24 }
  0x11   : > { %v520_v1 = vld.sshfl [vmem:[%s212_s19] sm:$0x33 pattern:$0x76325410]  ;;  %s231_s30 = scalar_lea.vmem %s660_s3, %s527_s24 }
  0x12   : > { %v256_v2 = vcombine.high %v520_v1, %v520_v1  ;;  %v266_v3 = vsel %vm264_vm0, %v520_v1, 0 }
  0x14   : > { %521 = vmatprep.subr.msk.bf16.mxu0 %vm264_vm0, %v256_v2  ;;  %529 = vmatprep.subr.msk.bf16.mxu1 %vm264_vm0, %v256_v2 }
  0x15   : > { %272 = vmatpush1.bf16.msra.mxu0 %v266_v3  ;;  %530 = vmatpush1.bf16.msra.mxu1 %v266_v3 }
  0x18   : > { %522 = vmatmul.mubr.msk.bf16.vlgmr.msra.gmra.mrb[0].mxu0 %vm257_vm1, %v556_v4  ;;  %523 = vmatmul.mubr.msk.bf16.vlgmr.msra.gmra.mrb[0].mxu1 %vm257_vm1, %v557_v5 }
  0xeb   : > { %v305_v6 = vpop.f32.mrb[0].mxu0  ;;  %v315_v7 = vpop.f32.mrb[0].mxu1 }
  0xec   : > { %v341_v8 = vmul.f32 %v305_v6, %v305_v6  ;;  %v345_v9 = vmul.f32 %v315_v7, %v315_v7  ;;  %v307_v10 = vpop.f32.mrb[1].mxu0  ;;  %v317_v11 = vpop.f32.mrb[1].mxu1 }
  0xed   : > { %v342_v12 = vmul.f32 %v307_v10, %v307_v10  ;;  %v346_v13 = vmul.f32 %v317_v11, %v317_v11  ;;  %v309_v14 = vpop.f32.mrb[2].mxu0  ;;  %v319_v15 = vpop.f32.mrb[2].mxu1  ;;  %v330_v16 = vadd.f32 %v317_v11, %v315_v7  ;;  %v324_v17 = vadd.f32 %v307_v10, %v305_v6 }
  0xee   : > { %v343_v18 = vmul.f32 %v309_v14, %v309_v14  ;;  %v347_v19 = vmul.f32 %v319_v15, %v319_v15  ;;  %v311_v20 = vpop.f32.mrb[3].mxu0  ;;  %v321_v21 = vpop.f32.mrb[3].mxu1 }
  0xef   : > { %v327_v22 = vadd.f32 %v311_v20, %v309_v14  ;;  %v344_v23 = vmul.f32 %v311_v20, %v311_v20  ;;  %v333_v24 = vadd.f32 %v321_v21, %v319_v15  ;;  %v348_v25 = vmul.f32 %v321_v21, %v321_v21  ;;  %331 = vadd.xlane.f32.xlu1 %v330_v16 }
  0xf0   : > { %325 = vadd.xlane.f32.xlu0 %v324_v17  ;;  %v349_v26 = vadd.f32 %v342_v12, %v341_v8  ;;  %v355_v27 = vadd.f32 %v346_v13, %v345_v9 }
  0xf1   : > { %v352_v28 = vadd.f32 %v344_v23, %v343_v18  ;;  %v358_v29 = vadd.f32 %v348_v25, %v347_v19 }
  0xf3   : > { %334 = vadd.xlane.f32.xlu1 %v333_v24 }
  0xf4   : > { %328 = vadd.xlane.f32.xlu0 %v327_v22 }
  0xf7   : > { %353 = vadd.xlane.f32.xlu1 %v352_v28 }
  0xf8   : > { %350 = vadd.xlane.f32.xlu0 %v349_v26 }
  0xfb   : > { %359 = vadd.xlane.f32.xlu1 %v358_v29 }
  0xfc   : > { %356 = vadd.xlane.f32.xlu0 %v355_v27 }
 0x17c   : > { %v332_v30 = vpop.xlane.xlu1 %331 }
 0x17d   : > { %339 = vst.msk [vmem:[%s222_s27 + $0x10] sm:$0xff] %vm336_vm2, %v332_v30  ;;  %v326_v31 = vpop.xlane.xlu0 %325 }
 0x17e   : > { %337 = vst.msk [vmem:[%s222_s27] sm:$0xff] %vm336_vm2, %v326_v31 }
 0x180   : > { %v335_v32 = vpop.xlane.xlu1 %334 }
 0x181   : > { %340 = vst.msk [vmem:[%s222_s27 + $0x18] sm:$0xff] %vm336_vm2, %v335_v32  ;;  %v329_v33 = vpop.xlane.xlu0 %328 }
 0x182   : > { %338 = vst.msk [vmem:[%s222_s27 + $0x8] sm:$0xff] %vm336_vm2, %v329_v33 }
 0x184   : > { %v354_v34 = vpop.xlane.xlu1 %353 }
 0x185   : > { %362 = vst.msk [vmem:[%s231_s30 + $0x8] sm:$0xff] %vm336_vm2, %v354_v34  ;;  %v351_v35 = vpop.xlane.xlu0 %350 }
 0x186   : > { %361 = vst.msk [vmem:[%s231_s30] sm:$0xff] %vm336_vm2, %v351_v35 }
 0x188   : > { %v360_v36 = vpop.xlane.xlu1 %359 }
 0x189   : > { %364 = vst.msk [vmem:[%s231_s30 + $0x18] sm:$0xff] %vm336_vm2, %v360_v36  ;;  %v357_v37 = vpop.xlane.xlu0 %356 }
 0x18a   : > { %363 = vst.msk [vmem:[%s231_s30 + $0x10] sm:$0xff] %vm336_vm2, %v357_v37 }
 0x18b PF: > { %s14_s14 = sadd.s32 1, %s580_s14   ;;  %s661_s12 = smov %s576_s13 }
 0x18c   : > { %p11_p5 = scmp.ge.s32.totalorder %s14_s14, 4   ;;  %s662_s13 = smov %s664_s15 }
 0x18e   :  { %13 = sbr.rel (!%p11_p5) target bundleno = 2 (0x2), region = 70 }

</bundles_post_ra>
